<compile_context>
chip_gen: v7x
topology: tpu7x:2x2x1
jax: 0.10.0
libtpu: 0.0.40
codegen_flags: <defaults>
</compile_context>

<pallas_src>
import jax
import jax.numpy as jnp
from jax.experimental import pallas as pl
from jax.experimental.pallas import tpu as pltpu


# --------------------------- model configuration ----------------------------

IN_FEAT = 26
F_PAD = 32            # input feature dim zero-padded to a sublane multiple
CONV_HIDDEN = 32
CLS_HIDDEN = 32
N_LAYERS = 2
NUM_CLASSES = 2

H_PAD = 128           # lane-dense activation width (real cols: 0..31)
W_COLS = 2 * H_PAD    # 256: W_l in lanes [0,128), W_r / W_m2 in lanes [128,256)
B_PAD = 8             # sublane-dense pooled rows (sliced back to B outside)
C_PAD = 128           # lane-dense output width (sliced back to 2 outside)

# Packed-slab row offsets (all multiples of the bf16 sublane tile).
ROW_W1 = 0
ROW_HIDDEN = ROW_W1 + F_PAD                 # 32
ROW_HEAD = ROW_HIDDEN + N_LAYERS * H_PAD    # 288
ROW_BIAS = ROW_HEAD + H_PAD                 # 416
N_BIAS_ROWS = 16
SLAB_ROWS = ROW_BIAS + N_BIAS_ROWS          # 432

_VMEM = pl.BlockSpec(memory_space=pltpu.MemorySpace.VMEM)


# ------------------------------ fused kernel --------------------------------

def fused_forward_kernel(a_ref, p_ref, x_ref, w_ref, o_ref):
    """Whole forward pass in a single kernel, params carved from one slab.

    SAGEConv(mean):  h = A @ (X @ W_l) + X @ W_r + b_l
                     ([W_l | W_r] lane-tile-aligned -> one X @ Wcat matmul)
    readout:         pooled = P @ h   (densified global_mean_pool)
    head:            Linear -> ReLU -> (Dropout: eval identity) -> Linear
    """
    f32, bf16 = jnp.float32, jnp.bfloat16
    a = a_ref[...]                                            # (N, N) bf16

    def bias(i):                                              # (1, 128) f32
        return w_ref[ROW_BIAS + i:ROW_BIAS + i + 1, :H_PAD].astype(f32)

    def sage(x_bf, row0, rows):
        wcat = w_ref[row0:row0 + rows, :]                     # (rows, 256) bf16
        xw = jnp.dot(x_bf, wcat, preferred_element_type=f32)  # (N, 256) f32
        agg = jnp.dot(a, xw[:, :H_PAD].astype(bf16),          # A @ (X @ W_l)
                      preferred_element_type=f32)
        return agg + xw[:, H_PAD:]                            # + X @ W_r

    # ---- conv1 (26 -> H; feature dim zero-padded to 32, exact) ----
    h = sage(x_ref[...], ROW_W1, F_PAD) + bias(0)

    # ---- hidden SAGEConv layers (statically unrolled) ----
    for l in range(N_LAYERS):
        h = sage(h.astype(bf16), ROW_HIDDEN + l * H_PAD, H_PAD) + bias(1 + l)

    # ---- global mean pool + MLP head ----
    pooled = jnp.dot(p_ref[...], h.astype(bf16), preferred_element_type=f32)
    wm1 = w_ref[ROW_HEAD:ROW_HEAD + H_PAD, :H_PAD]            # (128, 128) bf16
    wm2 = w_ref[ROW_HEAD:ROW_HEAD + H_PAD, H_PAD:]            # (128, 128) bf16
    z = jnp.dot(pooled.astype(bf16), wm1, preferred_element_type=f32) + bias(1 + N_LAYERS)
    z = jnp.maximum(z, 0.0)
    # TODO(synk): Dropout(p=cls_drop) is identity in eval mode; train-mode masking omitted.
    o_ref[...] = jnp.dot(z.astype(bf16), wm2, preferred_element_type=f32) + bias(2 + N_LAYERS)


@jax.jit
def model_forward(w_slab, A, P_pad, x_pad):
    """Single fused pallas_call; returns the padded (8, 128) logits slab."""
    return pl.pallas_call(
        fused_forward_kernel,
        out_shape=jax.ShapeDtypeStruct((B_PAD, C_PAD), jnp.float32),
        in_specs=[_VMEM, _VMEM, _VMEM, _VMEM],
        out_specs=_VMEM,
    )(A, P_pad, x_pad, w_slab)


# --------------------------- parameter construction -------------------------

def init_params(key):
    """Build the single packed, padded, bf16 parameter slab (432, 256)."""

    def lin(k, fin, fout, scale=0.1):
        kw, kb = jax.random.split(k)
        w = scale * jax.random.normal(kw, (fin, fout), jnp.float32)  # pre-transposed
        b = scale * jax.random.normal(kb, (fout,), jnp.float32)
        return w, b

    keys = jax.random.split(key, 4 + 2 * N_LAYERS)
    ki = iter(keys)

    slab = jnp.zeros((SLAB_ROWS, W_COLS), jnp.float32)

    def put_wcat(s, row0, wl, wr):
        # W_l in lanes [0, fout), W_r (or W_m2) in lanes [128, 128+fout): tile-aligned.
        s = s.at[row0:row0 + wl.shape[0], 0:wl.shape[1]].set(wl)
        s = s.at[row0:row0 + wr.shape[0], H_PAD:H_PAD + wr.shape[1]].set(wr)
        return s

    def put_bias(s, i, b):
        return s.at[ROW_BIAS + i, 0:b.shape[0]].set(b)

    # conv1: SAGEConv(26, H) — lin_l (with bias) on aggregated msgs, lin_r (no bias) on root.
    wl1, bl1 = lin(next(ki), IN_FEAT, CONV_HIDDEN)
    wr1, _ = lin(next(ki), IN_FEAT, CONV_HIDDEN)
    slab = put_wcat(slab, ROW_W1, wl1, wr1)
    slab = put_bias(slab, 0, bl1)

    # hidden SAGEConv(H, H) layers
    for l in range(N_LAYERS):
        wl, bl = lin(next(ki), CONV_HIDDEN, CONV_HIDDEN)
        wr, _ = lin(next(ki), CONV_HIDDEN, CONV_HIDDEN)
        slab = put_wcat(slab, ROW_HIDDEN + l * H_PAD, wl, wr)
        slab = put_bias(slab, 1 + l, bl)

    # MLP head: Wm1 in lanes [0,128), Wm2 in lanes [128,256) of the same block.
    wm1, bm1 = lin(next(ki), CONV_HIDDEN, CLS_HIDDEN)
    wm2, bm2 = lin(next(ki), CLS_HIDDEN, NUM_CLASSES)
    slab = put_wcat(slab, ROW_HEAD, wm1, wm2)
    slab = put_bias(slab, 1 + N_LAYERS, bm1)
    slab = put_bias(slab, 2 + N_LAYERS, bm2)

    return slab.astype(jnp.bfloat16)


# ----------------------------------- main ------------------------------------

if __name__ == "__main__":
    key = jax.random.PRNGKey(0)
    kparam, kx = jax.random.split(key)

    # Two small graphs of 8 nodes each (bidirectional rings), batched: N = 16 nodes.
    NODES_PER_GRAPH, NUM_GRAPHS = 8, 2
    N = NODES_PER_GRAPH * NUM_GRAPHS

    src, dst = [], []
    for g in range(NUM_GRAPHS):
        base = g * NODES_PER_GRAPH
        for i in range(NODES_PER_GRAPH):
            u, v = base + i, base + (i + 1) % NODES_PER_GRAPH
            src += [u, v]
            dst += [v, u]
    edge_index = jnp.array([src, dst], dtype=jnp.int32)  # (2, E), src -> dst

    # Dense mean-aggregation matrix A (N, N): A[i, j] = 1/deg_in(i) for edge j->i.
    adj = jnp.zeros((N, N), jnp.float32).at[edge_index[1], edge_index[0]].add(1.0)
    deg = adj.sum(axis=1, keepdims=True)
    A = (adj / jnp.maximum(deg, 1.0)).astype(jnp.bfloat16)

    # Mean-pool matrix P built directly at (B_PAD, N); rows >= NUM_GRAPHS are zero.
    batch = jnp.repeat(jnp.arange(NUM_GRAPHS, dtype=jnp.int32), NODES_PER_GRAPH)
    onehot = (batch[None, :] == jnp.arange(B_PAD)[:, None]).astype(jnp.float32)
    P = (onehot / jnp.maximum(onehot.sum(axis=1, keepdims=True), 1.0)).astype(jnp.bfloat16)

    # Node features mol.x: (N, 26), pre-padded once (outside the hot path) to (N, 32).
    x = jax.random.normal(kx, (N, IN_FEAT), jnp.float32)
    x_pad = jnp.pad(x, ((0, 0), (0, F_PAD - IN_FEAT))).astype(jnp.bfloat16)

    w_slab = init_params(kparam)

    out_pad = jax.block_until_ready(model_forward(w_slab, A, P, x_pad))  # (8, 128)
    out = out_pad[:NUM_GRAPHS, :NUM_CLASSES]                              # (B, 2)

    assert out.shape == (NUM_GRAPHS, NUM_CLASSES), out.shape
    assert bool(jnp.all(jnp.isfinite(out_pad)))
    print("KERNEL_OK")
</pallas_src>

<mosaic_0001>
module attributes {stable_mosaic.version = 11 : i64} {
  func.func @fused_forward_kernel(%arg0: memref<16x16xbf16, #tpu.memory_space<vmem>>, %arg1: memref<8x16xbf16, #tpu.memory_space<vmem>>, %arg2: memref<16x32xbf16, #tpu.memory_space<vmem>>, %arg3: memref<432x256xbf16, #tpu.memory_space<vmem>>, %arg4: memref<8x128xf32, #tpu.memory_space<vmem>>) attributes {dimension_semantics = [], scalar_prefetch = 0 : i64, scratch_operands = 0 : i64, tpu.core_type = #tpu.core_type<tc>} {
    %c0 = arith.constant 0 : index
    %c0_0 = arith.constant 0 : index
    %0 = vector.load %arg0[%c0, %c0_0] : memref<16x16xbf16, #tpu.memory_space<vmem>>, vector<16x16xbf16>
    %c0_1 = arith.constant 0 : index
    %c0_2 = arith.constant 0 : index
    %1 = vector.load %arg2[%c0_1, %c0_2] : memref<16x32xbf16, #tpu.memory_space<vmem>>, vector<16x32xbf16>
    %c0_3 = arith.constant 0 : index
    %c0_4 = arith.constant 0 : index
    %2 = vector.load %arg3[%c0_3, %c0_4] : memref<432x256xbf16, #tpu.memory_space<vmem>>, vector<32x256xbf16>
    %cst = arith.constant dense<0.000000e+00> : vector<16x256xf32>
    %3 = tpu.matmul %1, %2, %cst {dimension_numbers = #tpu.dot_dimension_numbers<[1], [0], [0], [1], [0, 0, 1, 1], [], []>} : vector<16x32xbf16>, vector<32x256xbf16>, vector<16x256xf32> -> vector<16x256xf32>
    %4 = vector.extract_strided_slice %3 {offsets = [0, 0], sizes = [16, 128], strides = [1, 1]} : vector<16x256xf32> to vector<16x128xf32>
    %5 = arith.truncf %4 : vector<16x128xf32> to vector<16x128xbf16>
    %cst_5 = arith.constant dense<0.000000e+00> : vector<16x128xf32>
    %6 = tpu.matmul %0, %5, %cst_5 {dimension_numbers = #tpu.dot_dimension_numbers<[1], [0], [0], [1], [0, 0, 1, 1], [], []>} : vector<16x16xbf16>, vector<16x128xbf16>, vector<16x128xf32> -> vector<16x128xf32>
    %7 = vector.extract_strided_slice %3 {offsets = [0, 128], sizes = [16, 128], strides = [1, 1]} : vector<16x256xf32> to vector<16x128xf32>
    %8 = arith.addf %6, %7 : vector<16x128xf32>
    %c416 = arith.constant 416 : index
    %c0_6 = arith.constant 0 : index
    %9 = vector.load %arg3[%c416, %c0_6] : memref<432x256xbf16, #tpu.memory_space<vmem>>, vector<1x128xbf16>
    %10 = arith.extf %9 : vector<1x128xbf16> to vector<1x128xf32>
    %11 = vector.broadcast %10 : vector<1x128xf32> to vector<16x128xf32>
    %12 = arith.addf %8, %11 : vector<16x128xf32>
    %13 = arith.truncf %12 : vector<16x128xf32> to vector<16x128xbf16>
    %c32 = arith.constant 32 : index
    %c0_7 = arith.constant 0 : index
    %14 = vector.load %arg3[%c32, %c0_7] : memref<432x256xbf16, #tpu.memory_space<vmem>>, vector<128x256xbf16>
    %cst_8 = arith.constant dense<0.000000e+00> : vector<16x256xf32>
    %15 = tpu.matmul %13, %14, %cst_8 {dimension_numbers = #tpu.dot_dimension_numbers<[1], [0], [0], [1], [0, 0, 1, 1], [], []>} : vector<16x128xbf16>, vector<128x256xbf16>, vector<16x256xf32> -> vector<16x256xf32>
    %16 = vector.extract_strided_slice %15 {offsets = [0, 0], sizes = [16, 128], strides = [1, 1]} : vector<16x256xf32> to vector<16x128xf32>
    %17 = arith.truncf %16 : vector<16x128xf32> to vector<16x128xbf16>
    %cst_9 = arith.constant dense<0.000000e+00> : vector<16x128xf32>
    %18 = tpu.matmul %0, %17, %cst_9 {dimension_numbers = #tpu.dot_dimension_numbers<[1], [0], [0], [1], [0, 0, 1, 1], [], []>} : vector<16x16xbf16>, vector<16x128xbf16>, vector<16x128xf32> -> vector<16x128xf32>
    %19 = vector.extract_strided_slice %15 {offsets = [0, 128], sizes = [16, 128], strides = [1, 1]} : vector<16x256xf32> to vector<16x128xf32>
    %20 = arith.addf %18, %19 : vector<16x128xf32>
    %c417 = arith.constant 417 : index
    %c0_10 = arith.constant 0 : index
    %21 = vector.load %arg3[%c417, %c0_10] : memref<432x256xbf16, #tpu.memory_space<vmem>>, vector<1x128xbf16>
    %22 = arith.extf %21 : vector<1x128xbf16> to vector<1x128xf32>
    %23 = vector.broadcast %22 : vector<1x128xf32> to vector<16x128xf32>
    %24 = arith.addf %20, %23 : vector<16x128xf32>
    %25 = arith.truncf %24 : vector<16x128xf32> to vector<16x128xbf16>
    %c160 = arith.constant 160 : index
    %c0_11 = arith.constant 0 : index
    %26 = vector.load %arg3[%c160, %c0_11] : memref<432x256xbf16, #tpu.memory_space<vmem>>, vector<128x256xbf16>
    %cst_12 = arith.constant dense<0.000000e+00> : vector<16x256xf32>
    %27 = tpu.matmul %25, %26, %cst_12 {dimension_numbers = #tpu.dot_dimension_numbers<[1], [0], [0], [1], [0, 0, 1, 1], [], []>} : vector<16x128xbf16>, vector<128x256xbf16>, vector<16x256xf32> -> vector<16x256xf32>
    %28 = vector.extract_strided_slice %27 {offsets = [0, 0], sizes = [16, 128], strides = [1, 1]} : vector<16x256xf32> to vector<16x128xf32>
    %29 = arith.truncf %28 : vector<16x128xf32> to vector<16x128xbf16>
    %cst_13 = arith.constant dense<0.000000e+00> : vector<16x128xf32>
    %30 = tpu.matmul %0, %29, %cst_13 {dimension_numbers = #tpu.dot_dimension_numbers<[1], [0], [0], [1], [0, 0, 1, 1], [], []>} : vector<16x16xbf16>, vector<16x128xbf16>, vector<16x128xf32> -> vector<16x128xf32>
    %31 = vector.extract_strided_slice %27 {offsets = [0, 128], sizes = [16, 128], strides = [1, 1]} : vector<16x256xf32> to vector<16x128xf32>
    %32 = arith.addf %30, %31 : vector<16x128xf32>
    %c418 = arith.constant 418 : index
    %c0_14 = arith.constant 0 : index
    %33 = vector.load %arg3[%c418, %c0_14] : memref<432x256xbf16, #tpu.memory_space<vmem>>, vector<1x128xbf16>
    %34 = arith.extf %33 : vector<1x128xbf16> to vector<1x128xf32>
    %35 = vector.broadcast %34 : vector<1x128xf32> to vector<16x128xf32>
    %36 = arith.addf %32, %35 : vector<16x128xf32>
    %c0_15 = arith.constant 0 : index
    %c0_16 = arith.constant 0 : index
    %37 = vector.load %arg1[%c0_15, %c0_16] : memref<8x16xbf16, #tpu.memory_space<vmem>>, vector<8x16xbf16>
    %38 = arith.truncf %36 : vector<16x128xf32> to vector<16x128xbf16>
    %cst_17 = arith.constant dense<0.000000e+00> : vector<8x128xf32>
    %39 = tpu.matmul %37, %38, %cst_17 {dimension_numbers = #tpu.dot_dimension_numbers<[1], [0], [0], [1], [0, 0, 1, 1], [], []>} : vector<8x16xbf16>, vector<16x128xbf16>, vector<8x128xf32> -> vector<8x128xf32>
    %c288 = arith.constant 288 : index
    %c0_18 = arith.constant 0 : index
    %40 = vector.load %arg3[%c288, %c0_18] : memref<432x256xbf16, #tpu.memory_space<vmem>>, vector<128x128xbf16>
    %c288_19 = arith.constant 288 : index
    %c128 = arith.constant 128 : index
    %41 = vector.load %arg3[%c288_19, %c128] : memref<432x256xbf16, #tpu.memory_space<vmem>>, vector<128x128xbf16>
    %42 = arith.truncf %39 : vector<8x128xf32> to vector<8x128xbf16>
    %cst_20 = arith.constant dense<0.000000e+00> : vector<8x128xf32>
    %43 = tpu.matmul %42, %40, %cst_20 {dimension_numbers = #tpu.dot_dimension_numbers<[1], [0], [0], [1], [0, 0, 1, 1], [], []>} : vector<8x128xbf16>, vector<128x128xbf16>, vector<8x128xf32> -> vector<8x128xf32>
    %c419 = arith.constant 419 : index
    %c0_21 = arith.constant 0 : index
    %44 = vector.load %arg3[%c419, %c0_21] : memref<432x256xbf16, #tpu.memory_space<vmem>>, vector<1x128xbf16>
    %45 = arith.extf %44 : vector<1x128xbf16> to vector<1x128xf32>
    %46 = vector.broadcast %45 : vector<1x128xf32> to vector<8x128xf32>
    %47 = arith.addf %43, %46 : vector<8x128xf32>
    %cst_22 = arith.constant 0.000000e+00 : f32
    %48 = vector.broadcast %cst_22 : f32 to vector<8x128xf32>
    %49 = arith.maximumf %47, %48 : vector<8x128xf32>
    %50 = arith.truncf %49 : vector<8x128xf32> to vector<8x128xbf16>
    %cst_23 = arith.constant dense<0.000000e+00> : vector<8x128xf32>
    %51 = tpu.matmul %50, %41, %cst_23 {dimension_numbers = #tpu.dot_dimension_numbers<[1], [0], [0], [1], [0, 0, 1, 1], [], []>} : vector<8x128xbf16>, vector<128x128xbf16>, vector<8x128xf32> -> vector<8x128xf32>
    %c420 = arith.constant 420 : index
    %c0_24 = arith.constant 0 : index
    %52 = vector.load %arg3[%c420, %c0_24] : memref<432x256xbf16, #tpu.memory_space<vmem>>, vector<1x128xbf16>
    %53 = arith.extf %52 : vector<1x128xbf16> to vector<1x128xf32>
    %54 = vector.broadcast %53 : vector<1x128xf32> to vector<8x128xf32>
    %55 = arith.addf %51, %54 : vector<8x128xf32>
    %c0_25 = arith.constant 0 : index
    %c0_26 = arith.constant 0 : index
    %56 = vector.load %arg4[%c0_25, %c0_26] : memref<8x128xf32, #tpu.memory_space<vmem>>, vector<8x128xf32>
    tpu.vector_store %arg4[%c0_25, %c0_26], %55 {strides = array<i32>} : memref<8x128xf32, #tpu.memory_space<vmem>>, vector<8x128xf32>,
    return
  }
}

</mosaic_0001>

<bundles_post_ra>
// kernel: model_forward.1
= control target key start
LH: loop header
LB: loop body
LE: loop exit
PB: predicated region body
PF: predicated region fallthrough
CT: control target
= control target key end

     0   :  { %9 = vsyncpa [#allocation3], 0  ;;  %s1329_s0 = inlined_call_operand.hbm [shape: bf16[16,16], index: 0, kind: input, shape index: {}]   ;;  %s1330_s1 = inlined_call_operand.hbm [shape: bf16[8,16], index: 1, kind: input, shape index: {}]   ;;  %s1331_s2 = inlined_call_operand.vmem [shape: bf16[16,32], index: 2, kind: input, shape index: {}]   ;;  %s1332_s3 = inlined_call_operand.hbm [shape: bf16[432,256], index: 3, kind: input, shape index: {}]   ;;  %s1333_s4 = inlined_call_operand.hbm [shape: f32[8,128], index: 4, kind: output, shape index: {}]  }
   0x1   :  { %10 = vsyncpa [#allocation6], 0 }
   0x2   :  { %11 = vsyncpa [#allocation4], 0  ;;  %s1184_s15 = smov [#allocation5]   ;;  %s1185_s17 = smov [#allocation2]  }
   0x3   :  { %s30_s16 = sshll.u32 %s1184_s15, 4  ;;  %s17_s18 = sshll.u32 %s1185_s17, 4  ;;  %s31_s16 = int_to_ptr.vmem [resolvable:$true] %s30_s16  ;;  %s1220_s18 = int_to_ptr.vmem [resolvable:$true] %s17_s18 }
   0x4   :  { %s1090_s21 = scalar_lea.hbm %s1330_s1, 64 }
   0x5   :  { %p1091_p0 = scmp.ne.s32.totalorder %s1330_s1, %s1090_s21  ;;  %p1094_p1 = scmp.lt.u32.totalorder %s1090_s21, %s1330_s1 }
   0x7   :  { %p1096_p2 = pnand %p1094_p1, %p1091_p0 }
   0x9   :  { %1099 = shalt.err (!%p1096_p2)
}
   0xa   :  { %s1100_s26 = scalar_lea.vmem %s31_s16, 64  ;;  %p1105_p4 = scmp.lt.s32.totalorder %s31_s16, %s31_s16 }
   0xb   :  { %p1101_p3 = scmp.ne.s32.totalorder %s31_s16, %s1100_s26  ;;  %p1106_p5 = scmp.lt.s32.totalorder %s1100_s26, %s1100_s26 }
   0xd   :  { %p1107_p6 = por %p1106_p5, %p1105_p4 }
   0xf   :  { %p1108_p7 = pnand %p1107_p6, %p1101_p3 }
  0x11   :  { %1111 = shalt.err (!%p1108_p7)
}
  0x12   :  { %33 = dma.hbm_to_vmem [thread:$0]  %s1330_s1, 64, %s31_s16, [#allocation6]  }
  0x13   :  { %s1112_s5 = scalar_lea.hbm %s1329_s0, 128 }
  0x14   :  { %p1113_p8 = scmp.ne.s32.totalorder %s1329_s0, %s1112_s5  ;;  %p1116_p9 = scmp.lt.u32.totalorder %s1112_s5, %s1329_s0 }
  0x16   :  { %p1118_p10 = pnand %p1116_p9, %p1113_p8 }
  0x18   :  { %1121 = shalt.err (!%p1118_p10)
}
  0x19   :  { %s1122_s10 = scalar_lea.vmem %s1220_s18, 128  ;;  %p1127_p12 = scmp.lt.s32.totalorder %s1220_s18, %s1220_s18 }
  0x1a   :  { %p1123_p11 = scmp.ne.s32.totalorder %s1220_s18, %s1122_s10  ;;  %p1128_p13 = scmp.lt.s32.totalorder %s1122_s10, %s1122_s10 }
  0x1c   :  { %p1129_p0 = por %p1128_p13, %p1127_p12 }
  0x1e   :  { %p1130_p1 = pnand %p1129_p0, %p1123_p11 }
  0x20   :  { %1133 = shalt.err (!%p1130_p1)
}
  0x21   :  { %s1186_s1 = smov 64   ;;  %s1187_s11 = smov 4  }
  0x22   :  { %23 = dma.hbm_to_vmem [thread:$0]  %s1329_s0, 128, %s1220_s18, [#allocation3], %s1186_s1, %s1186_s1, %s1187_s11  }
  0x23   :  { %s1188_s14 = smov [#allocation7]   ;;  %s1134_s19 = scalar_lea.hbm %s1332_s3, 6912 }
  0x24   :  { %s41_s15 = sshll.u32 %s1188_s14, 4  ;;  %p1135_p2 = scmp.ne.s32.totalorder %s1332_s3, %s1134_s19  ;;  %s42_s15 = int_to_ptr.vmem [resolvable:$true] %s41_s15 }
  0x25   :  { %p1138_p3 = scmp.lt.u32.totalorder %s1134_s19, %s1332_s3 }
  0x27   :  { %p1140_p4 = pnand %p1138_p3, %p1135_p2 }
  0x29   :  { %1143 = shalt.err (!%p1140_p4)
}
  0x2a   :  { %s1144_s24 = scalar_lea.vmem %s42_s15, 6912  ;;  %p1149_p6 = scmp.lt.s32.totalorder %s42_s15, %s42_s15 }
  0x2b   :  { %p1145_p5 = scmp.ne.s32.totalorder %s42_s15, %s1144_s24  ;;  %p1150_p7 = scmp.lt.s32.totalorder %s1144_s24, %s1144_s24 }
  0x2d   :  { %p1151_p8 = por %p1150_p7, %p1149_p6 }
  0x2f   :  { %p1152_p9 = pnand %p1151_p8, %p1145_p5 }
  0x31   :  { %1155 = shalt.err (!%p1152_p9)
}
  0x32   :  { %s1189_s0 = smov 128   ;;  %s1190_s18 = smov 8  }
  0x33   :  { %47 = dma.hbm_to_vmem [thread:$0]  %s1332_s3, 6912, %s42_s15, [#allocation6], %s1189_s0, %s1189_s0, %s1190_s18  }
  0x34   :  { %1178 = dma.done.wait [#allocation3], 128  }
  0x35   :  { %1179 = vsyncadd [#allocation3], 4294967168 }
  0x36   :  { %1180 = dma.done.wait [#allocation6], 6976  }
  0x37   :  { %1181 = vsyncadd [#allocation6], 4294960320  ;;  %v1191_v0 = vmov 0   ;;  %v1018_v1 = vld [vmem:[#allocation7 + $0x4] ss:$8 sps:$4 sm:$0xff]   ;;  %v1024_v5 = vld [vmem:[%s1331_s2] sm:$0xff]   ;;  %v191_v29 = vlaneseq }
  0x38   :  { %127 = vmatprep.mubr.bf16.mxu0 %v1191_v0  ;;  %v1020_v2 = vld [vmem:[#allocation7] ss:$8 sps:$4 sm:$0xff]   ;;  %95 = vmatprep.subr.bf16.mxu0 %v1018_v1  ;;  %v1021_v3 = vld [vmem:[#allocation7 + $0x14] ss:$8 sps:$4 sm:$0xff]   ;;  %v1023_v4 = vld [vmem:[#allocation7 + $0x10] ss:$8 sps:$4 sm:$0xff]  }
  0x39   :  { %96 = vmatpush1.bf16.msra.mxu0 %v1020_v2  ;;  %vm91_vm0 = vcmask 261120   ;;  %v1192_v6 = vmov 0.0   ;;  %vm1193_vm1 = vmmov 0   ;;  %v1028_v10 = vld [vmem:[#allocation7 + $0x24] ss:$8 sps:$4 sm:$0xff]   ;;  %v1273_v13 = vld [vmem:[#allocation2] sm:$0xff]  }
  0x3a   :  { %97 = vmatprep.subr.bf16.mxu0 %v1021_v3  ;;  %943 = vmatprep.subr.bf16.mxu1 %v1192_v6  ;;  %vm144_vm2 = vcmask 130048   ;;  %v1026_v14 = vld [vmem:[#allocation7 + $0x20] ss:$8 sps:$4 sm:$0xff]   ;;  %v1031_v15 = vld [vmem:[#allocation7 + $0x34] ss:$8 sps:$4 sm:$0xff]   ;;  %v1279_v30 = vshrl.u32 %v191_v29, 7 }
  0x3b   :  { %945 = vmatprep.mubr.msk.bf16.mxu1 %vm1193_vm1, %v1192_v6  ;;  %v1029_v16 = vld [vmem:[#allocation7 + $0x30] ss:$8 sps:$4 sm:$0xff]   ;;  %v1034_v17 = vld [vmem:[#allocation7 + $0x44] ss:$8 sps:$4 sm:$0xff]   ;;  %v1032_v18 = vld [vmem:[#allocation7 + $0x40] ss:$8 sps:$4 sm:$0xff]  }
  0x3c   :  { %v1037_v19 = vld [vmem:[#allocation7 + $0x54] ss:$8 sps:$4 sm:$0xff]   ;;  %v1035_v20 = vld [vmem:[#allocation7 + $0x50] ss:$8 sps:$4 sm:$0xff]   ;;  %v1040_v21 = vld [vmem:[#allocation7 + $0x64] ss:$8 sps:$4 sm:$0xff]  }
  0x3d   :  { %98 = vmatpush1.bf16.msra.mxu0 %v1023_v4  ;;  %v1038_v22 = vld [vmem:[#allocation7 + $0x60] ss:$8 sps:$4 sm:$0xff]   ;;  %v1043_v23 = vld [vmem:[#allocation7 + $0x74] ss:$8 sps:$4 sm:$0xff]   ;;  %v1041_v24 = vld [vmem:[#allocation7 + $0x70] ss:$8 sps:$4 sm:$0xff]  }
  0x3e   :  { %949 = vmatprep.subr.bf16.mxu0 %v1192_v6  ;;  %v1046_v25 = vld [vmem:[#allocation7 + $0x84] ss:$8 sps:$4 sm:$0xff]   ;;  %v1044_v26 = vld [vmem:[#allocation7 + $0x80] ss:$8 sps:$4 sm:$0xff]   ;;  %v1049_v27 = vld [vmem:[#allocation7 + $0x94] ss:$8 sps:$4 sm:$0xff]  }
  0x3f   :  { %v1047_v28 = vld [vmem:[#allocation7 + $0x90] ss:$8 sps:$4 sm:$0xff]   ;;  %v189_v31 = vld [vmem:[#allocation7 + $0x1a0] sm:$0x1]  ;;  %v193_v33 = vsub.s32 0, %v1279_v30  ;;  %v381_v1 = vsub.s32 1, %v1279_v30 }
  0x40   :  { %863 = vmatmul.mubr.msk.bf16.vlgmr.msra.gmra.mrb[0].mxu0 %vm91_vm0, %v1024_v5  ;;  %v190_v32 = vunpack.c.l.bf16 %v189_v31  ;;  %v1052_v47 = vld [vmem:[#allocation7 + $0xa4] ss:$8 sps:$4 sm:$0xff]   ;;  %v1050_v50 = vld [vmem:[#allocation7 + $0xa0] ss:$8 sps:$4 sm:$0xff]   ;;  %v1055_v51 = vld [vmem:[#allocation7 + $0xb4] ss:$8 sps:$4 sm:$0xff]  }
  0x41   :  { %951 = vmatprep.mubr.msk.bf16.mxu0 %vm1193_vm1, %v1192_v6  ;;  %v1053_v52 = vld [vmem:[#allocation7 + $0xb0] ss:$8 sps:$4 sm:$0xff]   ;;  %v1058_v53 = vld [vmem:[#allocation7 + $0xc4] ss:$8 sps:$4 sm:$0xff]   ;;  %v1056_v54 = vld [vmem:[#allocation7 + $0xc0] ss:$8 sps:$4 sm:$0xff]  }
  0x42   :  { %v194_v36 = vrot.slane %v190_v32, %v193_v33  ;;  %v1061_v55 = vld [vmem:[#allocation7 + $0xd4] ss:$8 sps:$4 sm:$0xff]   ;;  %v1059_v56 = vld [vmem:[#allocation7 + $0xd0] ss:$8 sps:$4 sm:$0xff]   ;;  %v1064_v57 = vld [vmem:[#allocation7 + $0xe4] ss:$8 sps:$4 sm:$0xff]   ;;  %v382_v4 = vrot.slane %v190_v32, %v381_v1 }
  0x43   :  { %v1062_v58 = vld [vmem:[#allocation7 + $0xe0] ss:$8 sps:$4 sm:$0xff]   ;;  %v1067_v59 = vld [vmem:[#allocation7 + $0xf4] ss:$8 sps:$4 sm:$0xff]   ;;  %v1065_v60 = vld [vmem:[#allocation7 + $0xf0] ss:$8 sps:$4 sm:$0xff]  }
  0x44   :  { %v1070_v61 = vld [vmem:[#allocation7 + $0x104] ss:$8 sps:$4 sm:$0xff]   ;;  %v1068_v62 = vld [vmem:[#allocation7 + $0x100] ss:$8 sps:$4 sm:$0xff]   ;;  %v1073_v63 = vld [vmem:[#allocation7 + $0x114] ss:$8 sps:$4 sm:$0xff]  }
  0x45   :  { %v751_v1 = vsub.s32 4, %v1279_v30  ;;  %s1194_s2 = smov [#allocation8]  }
  0x46   :  { %s848_s3 = sshll.u32 %s1194_s2, 4  ;;  %s849_s3 = int_to_ptr.vmem [resolvable:$true] %s848_s3 }
  0x47   :  { %s1156_s29 = scalar_lea.vmem %s849_s3, 128  ;;  %p1161_p11 = scmp.lt.s32.totalorder %s849_s3, %s849_s3 }
  0x48   :  { %p1157_p10 = scmp.ne.s32.totalorder %s849_s3, %s1156_s29  ;;  %p1162_p12 = scmp.lt.s32.totalorder %s1156_s29, %s1156_s29 }
  0x4a   :  { %p1163_p13 = por %p1162_p12, %p1161_p11 }
  0x4c   :  { %p1164_p0 = pnand %p1163_p13, %p1157_p10 }
 0x113   :  { %v129_v7 = vpop.f32.mrb[0].mxu0 }
 0x114   :  { %v131_v8 = vpop.f32.mrb[1].mxu0 }
 0x115   :  { %v133_v9 = vpop.f32.mrb[2].mxu0 }
 0x116   :  { %v138_v11 = vpack.c.bf16 %v133_v9, %v129_v7  ;;  %v135_v12 = vpop.f32.mrb[3].mxu0 }
 0x118   :  { %944 = vmatpush3.bf16.msra.mxu1 %v138_v11 }
 0x119   :  { %294 = vmatprep.subr.bf16.mxu1 %v1028_v10 }
 0x11b   :  { %946 = vmatmul.mubr.msk.bf16.vlgmr.msra.gmra.mrb[0].mxu1 %vm144_vm2, %v1273_v13 }
 0x11c   :  { %295 = vmatpush1.bf16.msra.mxu1 %v1026_v14  ;;  %326 = vmatprep.mubr.bf16.mxu1 %v1191_v0 }
 0x11d   :  { %296 = vmatprep.subr.bf16.mxu1 %v1031_v15 }
 0x120   :  { %297 = vmatpush1.bf16.msra.mxu1 %v1029_v16 }
 0x121   :  { %298 = vmatprep.subr.bf16.mxu1 %v1034_v17 }
 0x124   :  { %299 = vmatpush1.bf16.msra.mxu1 %v1032_v18 }
 0x125   :  { %300 = vmatprep.subr.bf16.mxu1 %v1037_v19  ;;  %v1074_v19 = vld [vmem:[#allocation7 + $0x120] ss:$8 sps:$4 sm:$0xff]  }
 0x128   :  { %301 = vmatpush1.bf16.msra.mxu1 %v1035_v20  ;;  %v1075_v20 = vld [vmem:[#allocation7 + $0x130] ss:$8 sps:$4 sm:$0xff]  }
 0x129   :  { %302 = vmatprep.subr.bf16.mxu1 %v1040_v21  ;;  %v1076_v21 = vld [vmem:[#allocation7 + $0x140] ss:$8 sps:$4 sm:$0xff]  }
 0x12c   :  { %303 = vmatpush1.bf16.msra.mxu1 %v1038_v22  ;;  %v1077_v22 = vld [vmem:[#allocation7 + $0x150] ss:$8 sps:$4 sm:$0xff]  }
 0x12d   :  { %304 = vmatprep.subr.bf16.mxu1 %v1043_v23  ;;  %v1078_v23 = vld [vmem:[#allocation7 + $0x160] ss:$8 sps:$4 sm:$0xff]  }
 0x130   :  { %305 = vmatpush1.bf16.msra.mxu1 %v1041_v24  ;;  %v1080_v24 = vld [vmem:[#allocation7 + $0x180] ss:$8 sps:$4 sm:$0xff]  }
 0x131   :  { %306 = vmatprep.subr.bf16.mxu1 %v1046_v25  ;;  %v567_v25 = vld [vmem:[#allocation7 + $0x1a0] sm:$0x2] }
 0x134   :  { %307 = vmatpush1.bf16.msra.mxu1 %v1044_v26  ;;  %v568_v26 = vunpack.c.l.bf16 %v567_v25 }
 0x135   :  { %308 = vmatprep.subr.bf16.mxu1 %v1049_v27  ;;  %v571_v27 = vsub.s32 2, %v1279_v30 }
 0x137   :  { %v572_v31 = vrot.slane %v568_v26, %v571_v27 }
 0x138   :  { %309 = vmatpush1.bf16.msra.mxu1 %v1047_v28 }
 0x139   :  { %955 = vmatprep.subr.bf16.mxu1 %v1192_v6 }
 0x1ee   :  { %v182_v34 = vpop.f32.mrb[0].mxu1 }
 0x1ef   :  { %v183_v35 = vadd.f32 %v182_v34, %v131_v8  ;;  %v947_v37 = vpop.f32.mrb[1].mxu1 }
 0x1f0   :  { %v185_v38 = vpop.f32.mrb[2].mxu1 }
 0x1f1   :  { %v186_v39 = vadd.f32 %v185_v38, %v135_v12  ;;  %v948_v40 = vpop.f32.mrb[3].mxu1  ;;  %v195_v41 = vadd.f32 %v194_v36, %v183_v35 }
 0x1f2   :  { %v1081_v40 = vld [vmem:[#allocation7 + $0x190] ss:$8 sps:$4 sm:$0xff]  }
 0x1f3   :  { %v196_v42 = vadd.f32 %v194_v36, %v186_v39  ;;  %v575_v39 = vld [vmem:[#allocation5] sm:$0xf] }
 0x1f5   :  { %v197_v43 = vpack.c.bf16 %v196_v42, %v195_v41  ;;  %v1082_v41 = vld [vmem:[#allocation7 + $0x124] ss:$8 sps:$4 sm:$0xff]   ;;  %v1083_v42 = vld [vmem:[#allocation7 + $0x134] ss:$8 sps:$4 sm:$0xff]  }
 0x1f7   :  { %327 = vmatmul.mubr.bf16.vlgmr.msra.gmra.mrb[4].mxu1 %v197_v43  ;;  %v1084_v43 = vld [vmem:[#allocation7 + $0x144] ss:$8 sps:$4 sm:$0xff]  }
 0x1f8   :  { %957 = vmatprep.mubr.msk.bf16.mxu1 %vm1193_vm1, %v1192_v6 }
 0x2ca   :  { %v328_v44 = vpop.f32.mrb[4].mxu1 }
 0x2cb   :  { %v330_v45 = vpop.f32.mrb[5].mxu1 }
 0x2cc   :  { %v332_v46 = vpop.f32.mrb[6].mxu1 }
 0x2cd   :  { %v337_v48 = vpack.c.bf16 %v332_v46, %v328_v44  ;;  %v334_v49 = vpop.f32.mrb[7].mxu1  ;;  %v1085_v44 = vld [vmem:[#allocation7 + $0x154] ss:$8 sps:$4 sm:$0xff]  }
 0x2ce   :  { %v1087_v46 = vld [vmem:[#allocation7 + $0x174] ss:$8 sps:$4 sm:$0xff]  }
 0x2cf   :  { %950 = vmatpush3.bf16.msra.mxu0 %v337_v48 }
 0x2d0   :  { %482 = vmatprep.subr.bf16.mxu0 %v1052_v47 }
 0x2d2   :  { %952 = vmatmul.mubr.msk.bf16.vlgmr.msra.gmra.mrb[4].mxu0 %vm144_vm2, %v1273_v13 }
 0x2d3   :  { %483 = vmatpush1.bf16.msra.mxu0 %v1050_v50  ;;  %514 = vmatprep.mubr.bf16.mxu0 %v1191_v0  ;;  %v1071_v0 = vld [vmem:[#allocation7 + $0x110] ss:$8 sps:$4 sm:$0xff]  }
 0x2d4   :  { %484 = vmatprep.subr.bf16.mxu0 %v1055_v51 }
 0x2d7   :  { %485 = vmatpush1.bf16.msra.mxu0 %v1053_v52  ;;  %v1088_v52 = vld [vmem:[#allocation7 + $0x184] ss:$8 sps:$4 sm:$0xff]  }
 0x2d8   :  { %486 = vmatprep.subr.bf16.mxu0 %v1058_v53  ;;  %v1089_v53 = vld [vmem:[#allocation7 + $0x194] ss:$8 sps:$4 sm:$0xff]  }
 0x2db   :  { %487 = vmatpush1.bf16.msra.mxu0 %v1056_v54  ;;  %v655_v54 = vsub.s32 3, %v1279_v30 }
 0x2dc   :  { %488 = vmatprep.subr.bf16.mxu0 %v1061_v55 }
 0x2dd   :  { %v656_v55 = vrot.slane %v568_v26, %v655_v54 }
 0x2df   :  { %489 = vmatpush1.bf16.msra.mxu0 %v1059_v56 }
 0x2e0   :  { %490 = vmatprep.subr.bf16.mxu0 %v1064_v57 }
 0x2e3   :  { %491 = vmatpush1.bf16.msra.mxu0 %v1062_v58 }
 0x2e4   :  { %492 = vmatprep.subr.bf16.mxu0 %v1067_v59 }
 0x2e7   :  { %493 = vmatpush1.bf16.msra.mxu0 %v1065_v60 }
 0x2e8   :  { %494 = vmatprep.subr.bf16.mxu0 %v1070_v61 }
 0x2eb   :  { %495 = vmatpush1.bf16.msra.mxu0 %v1068_v62 }
 0x2ec   :  { %496 = vmatprep.subr.bf16.mxu0 %v1073_v63  ;;  %v747_v63 = vld [vmem:[#allocation7 + $0x1a0] sm:$0x4] }
 0x2ef   :  { %497 = vmatpush1.bf16.msra.mxu0 %v1071_v0  ;;  %v748_v0 = vunpack.c.l.bf16 %v747_v63 }
 0x2f0   :  { %967 = vmatprep.subr.bf16.mxu0 %v1192_v6 }
 0x3a5   :  { %v372_v2 = vpop.f32.mrb[4].mxu0 }
 0x3a6   :  { %v373_v3 = vadd.f32 %v372_v2, %v330_v45  ;;  %v953_v5 = vpop.f32.mrb[5].mxu0  ;;  %v1086_v45 = vld [vmem:[#allocation7 + $0x164] ss:$8 sps:$4 sm:$0xff]   ;;  %v752_v2 = vrot.slane %v748_v0, %v751_v1 }
 0x3a7   :  { %v375_v7 = vpop.f32.mrb[6].mxu0 }
 0x3a8   :  { %v376_v8 = vadd.f32 %v375_v7, %v334_v49  ;;  %v954_v9 = vpop.f32.mrb[7].mxu0  ;;  %v383_v10 = vadd.f32 %v382_v4, %v373_v3 }
 0x3aa   :  { %v384_v11 = vadd.f32 %v382_v4, %v376_v8 }
 0x3ac   :  { %v385_v12 = vpack.c.bf16 %v384_v11, %v383_v10 }
 0x3ae   :  { %515 = vmatmul.mubr.bf16.vlgmr.msra.gmra.mrb[8].mxu0 %v385_v12 }
 0x3af   :  { %983 = vmatprep.mubr.msk.bf16.mxu0 %vm1193_vm1, %v1192_v6  ;;  %968 = vmatpush3.bf16.msra.mxu0 %v1074_v19 }
 0x3b0   :  { %969 = vmatprep.subr.bf16.mxu0 %v1192_v6 }
 0x3b3   :  { %970 = vmatpush3.bf16.msra.mxu0 %v1075_v20 }
 0x3b4   :  { %971 = vmatprep.subr.bf16.mxu0 %v1192_v6 }
 0x3b7   :  { %972 = vmatpush3.bf16.msra.mxu0 %v1076_v21 }
 0x3b8   :  { %973 = vmatprep.subr.bf16.mxu0 %v1192_v6 }
 0x3bb   :  { %974 = vmatpush3.bf16.msra.mxu0 %v1077_v22 }
 0x3bc   :  { %975 = vmatprep.subr.bf16.mxu0 %v1192_v6 }
 0x3bf   :  { %976 = vmatpush3.bf16.msra.mxu0 %v1078_v23 }
 0x3c0   :  { %977 = vmatprep.subr.bf16.mxu0 %v1192_v6 }
 0x481   :  { %v516_v14 = vpop.f32.mrb[8].mxu0 }
 0x482   :  { %v518_v15 = vpop.f32.mrb[9].mxu0 }
 0x483   :  { %v520_v16 = vpop.f32.mrb[10].mxu0 }
 0x484   :  { %v525_v17 = vpack.c.bf16 %v520_v16, %v516_v14  ;;  %v522_v18 = vpop.f32.mrb[11].mxu0 }
 0x486   :  { %956 = vmatpush3.bf16.msra.mxu1 %v525_v17 }
 0x487   :  { %961 = vmatprep.subr.bf16.mxu1 %v1192_v6 }
 0x489   :  { %958 = vmatmul.mubr.msk.bf16.vlgmr.msra.gmra.mrb[8].mxu1 %vm144_vm2, %v1273_v13  ;;  %v1079_v13 = vld [vmem:[#allocation7 + $0x170] ss:$8 sps:$4 sm:$0xff]  }
 0x48a   :  { %963 = vmatprep.mubr.msk.bf16.mxu1 %vm1193_vm1, %v1192_v6  ;;  %978 = vmatpush3.bf16.msra.mxu0 %v1079_v13 }
 0x48b   :  { %979 = vmatprep.subr.bf16.mxu0 %v1192_v6 }
 0x48e   :  { %980 = vmatpush3.bf16.msra.mxu0 %v1080_v24 }
 0x48f   :  { %981 = vmatprep.subr.bf16.mxu0 %v1192_v6 }
 0x492   :  { %982 = vmatpush3.bf16.msra.mxu0 %v1081_v40 }
 0x55c   :  { %v560_v28 = vpop.f32.mrb[8].mxu1 }
 0x55d   :  { %v561_v29 = vadd.f32 %v560_v28, %v518_v15  ;;  %v959_v32 = vpop.f32.mrb[9].mxu1 }
 0x55e   :  { %v563_v33 = vpop.f32.mrb[10].mxu1 }
 0x55f   :  { %v564_v34 = vadd.f32 %v563_v33, %v522_v18  ;;  %v960_v35 = vpop.f32.mrb[11].mxu1  ;;  %v573_v36 = vadd.f32 %v572_v31, %v561_v29 }
 0x561   :  { %v574_v37 = vadd.f32 %v572_v31, %v564_v34 }
 0x563   :  { %v576_v38 = vpack.c.bf16 %v574_v37, %v573_v36 }
 0x565   :  { %962 = vmatpush3.bf16.msra.mxu1 %v576_v38 }
 0x566   :  { %987 = vmatprep.subr.bf16.mxu1 %v1192_v6 }
 0x568   :  { %964 = vmatmul.mubr.msk.bf16.vlgmr.msra.gmra.mrb[12].mxu1 %vm144_vm2, %v575_v39 }
 0x569   :  { %1003 = vmatprep.mubr.msk.bf16.mxu1 %vm1193_vm1, %v1192_v6  ;;  %988 = vmatpush3.bf16.msra.mxu1 %v1082_v41 }
 0x56a   :  { %989 = vmatprep.subr.bf16.mxu1 %v1192_v6 }
 0x56d   :  { %990 = vmatpush3.bf16.msra.mxu1 %v1083_v42 }
 0x56e   :  { %991 = vmatprep.subr.bf16.mxu1 %v1192_v6 }
 0x571   :  { %992 = vmatpush3.bf16.msra.mxu1 %v1084_v43 }
 0x572   :  { %993 = vmatprep.subr.bf16.mxu1 %v1192_v6 }
 0x575   :  { %994 = vmatpush3.bf16.msra.mxu1 %v1085_v44 }
 0x576   :  { %995 = vmatprep.subr.bf16.mxu1 %v1192_v6 }
 0x579   :  { %996 = vmatpush3.bf16.msra.mxu1 %v1086_v45 }
 0x57a   :  { %997 = vmatprep.subr.bf16.mxu1 %v1192_v6 }
 0x57d   :  { %998 = vmatpush3.bf16.msra.mxu1 %v1087_v46 }
 0x57e   :  { %999 = vmatprep.subr.bf16.mxu1 %v1192_v6 }
 0x581   :  { %1000 = vmatpush3.bf16.msra.mxu1 %v1088_v52 }
 0x582   :  { %1001 = vmatprep.subr.bf16.mxu1 %v1192_v6 }
 0x585   :  { %1002 = vmatpush3.bf16.msra.mxu1 %v1089_v53 }
 0x63b   :  { %v614_v47 = vpop.f32.mrb[12].mxu1 }
 0x63c   :  { %v652_v48 = vpack.c.bf16 %v614_v47, %v614_v47  ;;  %v965_v49 = vpop.f32.mrb[13].mxu1 }
 0x63d   :  { %v617_v50 = vpop.f32.mrb[14].mxu1 }
 0x63e   :  { %v966_v51 = vpop.f32.mrb[15].mxu1  ;;  %984 = vmatmul.mubr.bf16.vlgmr.msra.gmra.mrb[12].mxu0 %v652_v48 }
 0x711   :  { %v739_v56 = vpop.f32.mrb[12].mxu0 }
 0x712   :  { %v740_v57 = vadd.f32 %v739_v56, %v656_v55  ;;  %v985_v58 = vpop.f32.mrb[13].mxu0 }
 0x713   :  { %v742_v59 = vpop.f32.mrb[14].mxu0 }
 0x714   :  { %v745_v60 = vmax.f32 %v740_v57, 0.0  ;;  %v986_v61 = vpop.f32.mrb[15].mxu0 }
 0x716   :  { %v746_v62 = vpack.c.bf16 %v745_v60, %v745_v60 }
 0x718   :  { %1004 = vmatmul.mubr.bf16.vlgmr.msra.gmra.mrb[16].mxu1 %v746_v62 }
 0x7eb   :  { %v835_v6 = vpop.f32.mrb[16].mxu1 }
 0x7ec   :  { %v836_v3 = vadd.f32 %v835_v6, %v752_v2  ;;  %v1005_v4 = vpop.f32.mrb[17].mxu1 }
 0x7ed   :  { %v838_v5 = vpop.f32.mrb[18].mxu1 }
 0x7ee   :  { %841 = vst [vmem:[#allocation8] sm:$0xff] %v836_v3  ;;  %v1006_v7 = vpop.f32.mrb[19].mxu1 }
 0x7ef   :  { %1167 = shalt.err (!%p1164_p0)
}
 0x7f0   :  { %s1168_s6 = scalar_lea.hbm %s1333_s4, 128 }
 0x7f1   :  { %p1169_p1 = scmp.ne.s32.totalorder %s1333_s4, %s1168_s6  ;;  %p1172_p2 = scmp.lt.u32.totalorder %s1168_s6, %s1333_s4 }
 0x7f3   :  { %p1174_p3 = pnand %p1172_p2, %p1169_p1 }
 0x7f5   :  { %1177 = shalt.err (!%p1174_p3)
}
 0x7f6   :  { %851 = dma.vmem_to_hbm [thread:$0]  %s849_s3, 128, %s1333_s4, [#allocation4]  }
 0x7f7   :  { %1182 = dma.done.wait [#allocation4], 128  }
 0x7f8   :  { %1183 = vsyncadd [#allocation4], 4294967168 }
 0x7f9   :  { %855 = vsyncpa [#allocation3], 1 }
 0x7fa   :  { %856 = vsyncpa [#allocation6], 1 }
 0x7fb   :  { %857 = vsyncpa [#allocation4], 1 }

</bundles_post_ra>
